<compile_context>
chip_gen: v7x
topology: tpu7x:2x2x1
jax: 0.10.0
libtpu: 0.0.40
codegen_flags: <defaults>
</compile_context>

<pallas_src>
import functools
import math

import jax
import jax.numpy as jnp
import numpy as np
from jax.experimental import pallas as pl
from jax.experimental.pallas import tpu as pltpu


def _round_up(n, m):
    return ((n + m - 1) // m) * m


# ---------------------------------------------------------------------------
# In-kernel / reference math
# ---------------------------------------------------------------------------
def _layernorm_in_kernel(x, gamma, beta, eps=1e-6):
    """model_tools.LayerNorm: gamma * (x - mean) / (std + eps) + beta,
    with torch's *unbiased* std (N-1).  Division goes to the EUP via
    approximate reciprocal; (x - mean) is computed once and gamma is folded
    into the per-row scale."""
    n = x.shape[-1]
    mean = jnp.mean(x, axis=-1, keepdims=True)
    xc = x - mean
    var = jnp.sum(xc * xc, axis=-1, keepdims=True) * (1.0 / (n - 1))
    inv = pl.reciprocal(jnp.sqrt(var) + eps, approx=True)        # (B, 1) on EUP
    return xc * (gamma * inv) + beta


def _layernorm_ref(x, gamma, beta, eps=1e-6):
    n = x.shape[-1]
    mean = jnp.mean(x, axis=-1, keepdims=True)
    var = jnp.sum((x - mean) ** 2, axis=-1, keepdims=True) / (n - 1)
    return gamma * (x - mean) / (jnp.sqrt(var) + eps) + beta


def _apply_act(y, act_type):
    if act_type == "relu":
        return jnp.maximum(y, 0.0)
    if act_type == "tanh":
        return jnp.tanh(y)
    if act_type == "sigmoid":
        return jax.nn.sigmoid(y)
    if act_type == "leaky_relu":
        return jnp.where(y >= 0, y, 0.2 * y)
    if act_type == "elu":
        return jnp.where(y > 0, y, jnp.exp(y) - 1.0)
    if act_type == "softmax":          # nn.LogSoftmax(dim=1) on a (B, F) tensor
        return jax.nn.log_softmax(y, axis=-1)
    return y                            # 'linear'


# ---------------------------------------------------------------------------
# Fused Pallas kernel: whole MLP (all layers) in one invocation
# ---------------------------------------------------------------------------
def _mlp_fused_kernel(*refs, use_inp_ln, layer_cfg, matmul_dtype):
    """refs = [x, (ln0_g, ln0_b)?, per-layer: w, b, (g, be)? ..., out]."""
    it = iter(refs)
    x = next(it)[...]                                   # (Bt, Din) f32
    if use_inp_ln:
        g0 = next(it)[...]
        b0 = next(it)[...]
        x = _layernorm_in_kernel(x, g0, b0)
    for use_ln, act in layer_cfg:
        w = next(it)[...]                               # (Din_i, Dout_i[, pad])
        b = next(it)[...]                               # (1, Dout_i[, pad]) f32
        y = jnp.dot(x.astype(matmul_dtype), w,
                    preferred_element_type=jnp.float32) + b
        if use_ln:
            g = next(it)[...]
            be = next(it)[...]
            y = _layernorm_in_kernel(y, g, be)
        x = _apply_act(y, act)
        # Dropout is identity here (p = 0.0 / eval mode).
        # TODO(synk): training-mode dropout would need pltpu.prng_* masking.
    o_ref = next(it)
    o_ref[...] = x


def mlp_forward_pallas(x, options, params, ln0, flatten=True,
                       matmul_dtype=jnp.bfloat16):
    if flatten:
        x = x.reshape(x.shape[0], -1)                   # Flatten()
    x = x.astype(jnp.float32)
    B, Din = x.shape

    use_inp_ln = bool(options["fc_use_laynorm_inp"])
    acts = list(options["fc_act"])
    use_lns = [bool(v) for v in options["fc_use_laynorm"]]
    n_lay = len(params)
    # TODO(synk): fc_use_batchnorm / fc_use_batchnorm_inp are False in this
    # config; eval-mode BatchNorm would just be an extra affine elementwise.

    # ---- batch: pad to the f32 sublane grain (8) and tile over a grid ----
    B_pad = _round_up(B, 8)
    b_tile = min(B_pad, 512)
    B_pad = _round_up(B_pad, b_tile)
    if B_pad != B:
        x = jnp.pad(x, ((0, B_pad - B), (0, 0)))

    # ---- build operands: only refs the kernel actually reads ----
    operands = [x]
    in_specs = [pl.BlockSpec((b_tile, Din), lambda i: (i, 0))]

    def _resident(arr):
        # Full-array block, same index every grid step -> stays in VMEM.
        operands.append(arr)
        in_specs.append(pl.BlockSpec(arr.shape, lambda i: (0, 0)))

    if use_inp_ln:
        _resident(ln0["gamma"])
        _resident(ln0["beta"])

    layer_cfg = []
    out_dim = Din
    out_dim_padded = Din
    for i, p in enumerate(params):
        w = p["w"].astype(matmul_dtype)                 # bf16 weights: half DMA
        b = p["b"]                                      # bias stays f32
        d_out = w.shape[1]
        d_out_pad = d_out
        is_last = (i == n_lay - 1)
        # Lane-dense final store: pad Dout to a 128 multiple with zero columns
        # (only safe when no feature-reducing op follows the matmul).
        if is_last and (not use_lns[i]) and acts[i] != "softmax":
            d_out_pad = _round_up(d_out, 128)
            if d_out_pad != d_out:
                w = jnp.pad(w, ((0, 0), (0, d_out_pad - d_out)))
                b = jnp.pad(b, ((0, 0), (0, d_out_pad - d_out)))
        _resident(w)
        _resident(b)
        if use_lns[i]:
            _resident(p["gamma"])
            _resident(p["beta"])
        layer_cfg.append((use_lns[i], acts[i]))
        out_dim = d_out
        out_dim_padded = d_out_pad

    kernel = functools.partial(
        _mlp_fused_kernel,
        use_inp_ln=use_inp_ln,
        layer_cfg=tuple(layer_cfg),
        matmul_dtype=matmul_dtype,
    )

    out = pl.pallas_call(
        kernel,
        out_shape=jax.ShapeDtypeStruct((B_pad, out_dim_padded), jnp.float32),
        grid=(B_pad // b_tile,),
        in_specs=in_specs,
        out_specs=pl.BlockSpec((b_tile, out_dim_padded), lambda i: (i, 0)),
        compiler_params=pltpu.CompilerParams(
            dimension_semantics=("parallel",),          # megacore on v7x
            vmem_limit_bytes=64 << 20),
    )(*operands)

    return out[:B, :out_dim]


# ---------------------------------------------------------------------------
# Parameter construction (deterministic, mirrors MLP.__init__)
# ---------------------------------------------------------------------------
def init_mlp_params(options, key):
    input_dim = int(options["input_dim"])
    fc_lay = options["fc_lay"]
    params = []
    current_input = input_dim
    for out_dim in fc_lay:
        key, sub = jax.random.split(key)
        lim = math.sqrt(0.01 / (current_input + out_dim))
        # torch stores W as (out, in); we store the transpose (in, out).
        w = jax.random.uniform(sub, (current_input, out_dim),
                               minval=-lim, maxval=lim, dtype=jnp.float32)
        b = jnp.zeros((1, out_dim), dtype=jnp.float32)     # bias init to zeros
        gamma = jnp.ones((1, out_dim), dtype=jnp.float32)  # LayerNorm gamma
        beta = jnp.zeros((1, out_dim), dtype=jnp.float32)  # LayerNorm beta
        params.append(dict(w=w, b=b, gamma=gamma, beta=beta))
        current_input = out_dim
    ln0 = dict(gamma=jnp.ones((1, input_dim), dtype=jnp.float32),
               beta=jnp.zeros((1, input_dim), dtype=jnp.float32))
    return params, ln0


# ---------------------------------------------------------------------------
# Pure-JAX reference
# ---------------------------------------------------------------------------
def mlp_forward_ref(x, options, params, ln0, flatten=True):
    if flatten:
        x = x.reshape(x.shape[0], -1)
    if bool(options["fc_use_laynorm_inp"]):
        x = _layernorm_ref(x, ln0["gamma"], ln0["beta"])
    for i, p in enumerate(params):
        y = x @ p["w"] + p["b"]
        if bool(options["fc_use_laynorm"][i]):
            y = _layernorm_ref(y, p["gamma"], p["beta"])
        x = _apply_act(y, options["fc_act"][i])
    return x


# ---------------------------------------------------------------------------
if __name__ == "__main__":
    options = {
        "input_dim": 256,
        "fc_lay": [128, 64],
        "fc_drop": [0.0, 0.0],
        "fc_use_batchnorm": [False, False],
        "fc_use_laynorm": [True, False],
        "fc_use_laynorm_inp": True,
        "fc_use_batchnorm_inp": False,
        "fc_act": ["relu", "tanh"],
    }

    key = jax.random.PRNGKey(0)
    key, xkey = jax.random.split(key)
    # NCHW input, flattened inside the forward: (2, 4, 8, 8) -> (2, 256)
    x = jax.random.normal(xkey, (2, 4, 8, 8), dtype=jnp.float32)

    params, ln0 = init_mlp_params(options, key)
    ref = mlp_forward_ref(x, options, params, ln0, flatten=True)

    # 1) f32-MXU path: validates fused-kernel semantics (tolerance loosened
    #    only for the EUP approx-reciprocal inside LayerNorm).
    out_f32 = mlp_forward_pallas(x, options, params, ln0, flatten=True,
                                 matmul_dtype=jnp.float32)
    out_f32 = jax.block_until_ready(out_f32)
    np.testing.assert_allclose(np.asarray(out_f32), np.asarray(ref),
                               rtol=1e-2, atol=2e-3)

    # 2) Default bf16-MXU path (v6e/v7x native); looser tolerance for bf16.
    out = mlp_forward_pallas(x, options, params, ln0, flatten=True,
                             matmul_dtype=jnp.bfloat16)
    out = jax.block_until_ready(out)
    np.testing.assert_allclose(np.asarray(out), np.asarray(ref),
                               rtol=5e-2, atol=1e-2)

    assert out.shape == (2, 64)
    print("KERNEL_OK")
</pallas_src>

<mosaic_0001>
module attributes {stable_mosaic.version = 11 : i64} {
  func.func @_mlp_fused_kernel(%arg0: i32, %arg1: memref<8x256xf32, #tpu.memory_space<vmem>>, %arg2: memref<1x256xf32, #tpu.memory_space<vmem>>, %arg3: memref<1x256xf32, #tpu.memory_space<vmem>>, %arg4: memref<256x128xf32, #tpu.memory_space<vmem>>, %arg5: memref<1x128xf32, #tpu.memory_space<vmem>>, %arg6: memref<1x128xf32, #tpu.memory_space<vmem>>, %arg7: memref<1x128xf32, #tpu.memory_space<vmem>>, %arg8: memref<128x128xf32, #tpu.memory_space<vmem>>, %arg9: memref<1x128xf32, #tpu.memory_space<vmem>>, %arg10: memref<8x128xf32, #tpu.memory_space<vmem>>) attributes {dimension_semantics = [#tpu.dimension_semantics<parallel>], iteration_bounds = array<i64: 1>, scalar_prefetch = 0 : i64, scratch_operands = 0 : i64, tpu.core_type = #tpu.core_type<tc>, window_params = [{transform_indices = @transform_0, window_bounds = array<i64: 8, 256>}, {pipeline_mode = #tpu.pipeline_mode<synchronous>, transform_indices = @transform_1, window_bounds = array<i64: 1, 256>}, {pipeline_mode = #tpu.pipeline_mode<synchronous>, transform_indices = @transform_2, window_bounds = array<i64: 1, 256>}, {pipeline_mode = #tpu.pipeline_mode<synchronous>, transform_indices = @transform_3, window_bounds = array<i64: 256, 128>}, {pipeline_mode = #tpu.pipeline_mode<synchronous>, transform_indices = @transform_4, window_bounds = array<i64: 1, 128>}, {pipeline_mode = #tpu.pipeline_mode<synchronous>, transform_indices = @transform_5, window_bounds = array<i64: 1, 128>}, {pipeline_mode = #tpu.pipeline_mode<synchronous>, transform_indices = @transform_6, window_bounds = array<i64: 1, 128>}, {pipeline_mode = #tpu.pipeline_mode<synchronous>, transform_indices = @transform_7, window_bounds = array<i64: 128, 128>}, {pipeline_mode = #tpu.pipeline_mode<synchronous>, transform_indices = @transform_8, window_bounds = array<i64: 1, 128>}, {transform_indices = @transform_9, window_bounds = array<i64: 8, 128>}]} {
    %c0 = arith.constant 0 : index
    %c0_0 = arith.constant 0 : index
    %0 = vector.load %arg1[%c0, %c0_0] : memref<8x256xf32, #tpu.memory_space<vmem>>, vector<8x256xf32>
    %c0_1 = arith.constant 0 : index
    %c0_2 = arith.constant 0 : index
    %1 = vector.load %arg2[%c0_1, %c0_2] : memref<1x256xf32, #tpu.memory_space<vmem>>, vector<1x256xf32>
    %c0_3 = arith.constant 0 : index
    %c0_4 = arith.constant 0 : index
    %2 = vector.load %arg3[%c0_3, %c0_4] : memref<1x256xf32, #tpu.memory_space<vmem>>, vector<1x256xf32>
    %cst = arith.constant dense<0.000000e+00> : vector<8xf32>
    %3 = vector.multi_reduction <add>, %0, %cst [1] : vector<8x256xf32> to vector<8xf32>
    %4 = vector.shape_cast %3 : vector<8xf32> to vector<8x1xf32>
    %cst_5 = arith.constant 2.560000e+02 : f32
    %5 = vector.broadcast %cst_5 : f32 to vector<8x1xf32>
    %6 = arith.divf %4, %5 : vector<8x1xf32>
    %7 = vector.broadcast %6 : vector<8x1xf32> to vector<8x256xf32>
    %8 = arith.subf %0, %7 : vector<8x256xf32>
    %9 = arith.mulf %8, %8 : vector<8x256xf32>
    %cst_6 = arith.constant dense<0.000000e+00> : vector<8xf32>
    %10 = vector.multi_reduction <add>, %9, %cst_6 [1] : vector<8x256xf32> to vector<8xf32>
    %11 = vector.shape_cast %10 : vector<8xf32> to vector<8x1xf32>
    %cst_7 = arith.constant 0.00392156886 : f32
    %12 = vector.broadcast %cst_7 : f32 to vector<8x1xf32>
    %13 = arith.mulf %11, %12 : vector<8x1xf32>
    %14 = math.sqrt %13 : vector<8x1xf32>
    %cst_8 = arith.constant 9.99999997E-7 : f32
    %15 = vector.broadcast %cst_8 : f32 to vector<8x1xf32>
    %16 = arith.addf %14, %15 : vector<8x1xf32>
    %17 = tpu.reciprocal %16 {approx = true} : vector<8x1xf32> -> vector<8x1xf32>
    %18 = vector.broadcast %1 : vector<1x256xf32> to vector<8x256xf32>
    %19 = vector.broadcast %17 : vector<8x1xf32> to vector<8x256xf32>
    %20 = arith.mulf %18, %19 : vector<8x256xf32>
    %21 = arith.mulf %8, %20 : vector<8x256xf32>
    %22 = vector.broadcast %2 : vector<1x256xf32> to vector<8x256xf32>
    %23 = arith.addf %21, %22 : vector<8x256xf32>
    %c0_9 = arith.constant 0 : index
    %c0_10 = arith.constant 0 : index
    %24 = vector.load %arg4[%c0_9, %c0_10] : memref<256x128xf32, #tpu.memory_space<vmem>>, vector<256x128xf32>
    %c0_11 = arith.constant 0 : index
    %c0_12 = arith.constant 0 : index
    %25 = vector.load %arg5[%c0_11, %c0_12] : memref<1x128xf32, #tpu.memory_space<vmem>>, vector<1x128xf32>
    %cst_13 = arith.constant dense<0.000000e+00> : vector<8x128xf32>
    %26 = tpu.matmul %23, %24, %cst_13 {dimension_numbers = #tpu.dot_dimension_numbers<[1], [0], [0], [1], [0, 0, 1, 1], [], []>} : vector<8x256xf32>, vector<256x128xf32>, vector<8x128xf32> -> vector<8x128xf32>
    %27 = vector.broadcast %25 : vector<1x128xf32> to vector<8x128xf32>
    %28 = arith.addf %26, %27 : vector<8x128xf32>
    %c0_14 = arith.constant 0 : index
    %c0_15 = arith.constant 0 : index
    %29 = vector.load %arg6[%c0_14, %c0_15] : memref<1x128xf32, #tpu.memory_space<vmem>>, vector<1x128xf32>
    %c0_16 = arith.constant 0 : index
    %c0_17 = arith.constant 0 : index
    %30 = vector.load %arg7[%c0_16, %c0_17] : memref<1x128xf32, #tpu.memory_space<vmem>>, vector<1x128xf32>
    %cst_18 = arith.constant dense<0.000000e+00> : vector<8xf32>
    %31 = vector.multi_reduction <add>, %28, %cst_18 [1] : vector<8x128xf32> to vector<8xf32>
    %32 = vector.shape_cast %31 : vector<8xf32> to vector<8x1xf32>
    %cst_19 = arith.constant 1.280000e+02 : f32
    %33 = vector.broadcast %cst_19 : f32 to vector<8x1xf32>
    %34 = arith.divf %32, %33 : vector<8x1xf32>
    %35 = vector.broadcast %34 : vector<8x1xf32> to vector<8x128xf32>
    %36 = arith.subf %28, %35 : vector<8x128xf32>
    %37 = arith.mulf %36, %36 : vector<8x128xf32>
    %cst_20 = arith.constant dense<0.000000e+00> : vector<8xf32>
    %38 = vector.multi_reduction <add>, %37, %cst_20 [1] : vector<8x128xf32> to vector<8xf32>
    %39 = vector.shape_cast %38 : vector<8xf32> to vector<8x1xf32>
    %cst_21 = arith.constant 0.00787401571 : f32
    %40 = vector.broadcast %cst_21 : f32 to vector<8x1xf32>
    %41 = arith.mulf %39, %40 : vector<8x1xf32>
    %42 = math.sqrt %41 : vector<8x1xf32>
    %cst_22 = arith.constant 9.99999997E-7 : f32
    %43 = vector.broadcast %cst_22 : f32 to vector<8x1xf32>
    %44 = arith.addf %42, %43 : vector<8x1xf32>
    %45 = tpu.reciprocal %44 {approx = true} : vector<8x1xf32> -> vector<8x1xf32>
    %46 = vector.broadcast %29 : vector<1x128xf32> to vector<8x128xf32>
    %47 = vector.broadcast %45 : vector<8x1xf32> to vector<8x128xf32>
    %48 = arith.mulf %46, %47 : vector<8x128xf32>
    %49 = arith.mulf %36, %48 : vector<8x128xf32>
    %50 = vector.broadcast %30 : vector<1x128xf32> to vector<8x128xf32>
    %51 = arith.addf %49, %50 : vector<8x128xf32>
    %cst_23 = arith.constant 0.000000e+00 : f32
    %52 = vector.broadcast %cst_23 : f32 to vector<8x128xf32>
    %53 = arith.maximumf %51, %52 : vector<8x128xf32>
    %c0_24 = arith.constant 0 : index
    %c0_25 = arith.constant 0 : index
    %54 = vector.load %arg8[%c0_24, %c0_25] : memref<128x128xf32, #tpu.memory_space<vmem>>, vector<128x128xf32>
    %c0_26 = arith.constant 0 : index
    %c0_27 = arith.constant 0 : index
    %55 = vector.load %arg9[%c0_26, %c0_27] : memref<1x128xf32, #tpu.memory_space<vmem>>, vector<1x128xf32>
    %cst_28 = arith.constant dense<0.000000e+00> : vector<8x128xf32>
    %56 = tpu.matmul %53, %54, %cst_28 {dimension_numbers = #tpu.dot_dimension_numbers<[1], [0], [0], [1], [0, 0, 1, 1], [], []>} : vector<8x128xf32>, vector<128x128xf32>, vector<8x128xf32> -> vector<8x128xf32>
    %57 = vector.broadcast %55 : vector<1x128xf32> to vector<8x128xf32>
    %58 = arith.addf %56, %57 : vector<8x128xf32>
    %59 = math.tanh %58 : vector<8x128xf32>
    %c0_29 = arith.constant 0 : index
    %c0_30 = arith.constant 0 : index
    %60 = vector.load %arg10[%c0_29, %c0_30] : memref<8x128xf32, #tpu.memory_space<vmem>>, vector<8x128xf32>
    tpu.vector_store %arg10[%c0_29, %c0_30], %59 {strides = array<i32>} : memref<8x128xf32, #tpu.memory_space<vmem>>, vector<8x128xf32>,
    return
  }
  func.func @transform_0(%arg0: i32) -> (i32, i32) {
    %c0_i32 = arith.constant 0 : i32
    %c0_i32_0 = arith.constant 0 : i32
    return %arg0, %c0_i32 : i32, i32
  }
  func.func @transform_1(%arg0: i32) -> (i32, i32) {
    %c0_i32 = arith.constant 0 : i32
    %c0_i32_0 = arith.constant 0 : i32
    %c0_i32_1 = arith.constant 0 : i32
    return %c0_i32, %c0_i32_0 : i32, i32
  }
  func.func @transform_2(%arg0: i32) -> (i32, i32) {
    %c0_i32 = arith.constant 0 : i32
    %c0_i32_0 = arith.constant 0 : i32
    %c0_i32_1 = arith.constant 0 : i32
    return %c0_i32, %c0_i32_0 : i32, i32
  }
  func.func @transform_3(%arg0: i32) -> (i32, i32) {
    %c0_i32 = arith.constant 0 : i32
    %c0_i32_0 = arith.constant 0 : i32
    %c0_i32_1 = arith.constant 0 : i32
    return %c0_i32, %c0_i32_0 : i32, i32
  }
  func.func @transform_4(%arg0: i32) -> (i32, i32) {
    %c0_i32 = arith.constant 0 : i32
    %c0_i32_0 = arith.constant 0 : i32
    %c0_i32_1 = arith.constant 0 : i32
    return %c0_i32, %c0_i32_0 : i32, i32
  }
  func.func @transform_5(%arg0: i32) -> (i32, i32) {
    %c0_i32 = arith.constant 0 : i32
    %c0_i32_0 = arith.constant 0 : i32
    %c0_i32_1 = arith.constant 0 : i32
    return %c0_i32, %c0_i32_0 : i32, i32
  }
  func.func @transform_6(%arg0: i32) -> (i32, i32) {
    %c0_i32 = arith.constant 0 : i32
    %c0_i32_0 = arith.constant 0 : i32
    %c0_i32_1 = arith.constant 0 : i32
    return %c0_i32, %c0_i32_0 : i32, i32
  }
  func.func @transform_7(%arg0: i32) -> (i32, i32) {
    %c0_i32 = arith.constant 0 : i32
    %c0_i32_0 = arith.constant 0 : i32
    %c0_i32_1 = arith.constant 0 : i32
    return %c0_i32, %c0_i32_0 : i32, i32
  }
  func.func @transform_8(%arg0: i32) -> (i32, i32) {
    %c0_i32 = arith.constant 0 : i32
    %c0_i32_0 = arith.constant 0 : i32
    %c0_i32_1 = arith.constant 0 : i32
    return %c0_i32, %c0_i32_0 : i32, i32
  }
  func.func @transform_9(%arg0: i32) -> (i32, i32) {
    %c0_i32 = arith.constant 0 : i32
    %c0_i32_0 = arith.constant 0 : i32
    return %arg0, %c0_i32 : i32, i32
  }
}

</mosaic_0001>

<bundles_post_ra>
// kernel: tpu_custom_call.1
= control target key start
LH: loop header
LB: loop body
LE: loop exit
PB: predicated region body
PF: predicated region fallthrough
CT: control target
= control target key end

     0   :  { %14 = vsyncpa [#allocation3], 0  ;;  %s1078_s0 = inlined_call_operand.hbm [shape: f32[8,256], index: 0, kind: input, shape index: {}]   ;;  %s1079_s1 = inlined_call_operand.hbm [shape: f32[1,256], index: 1, kind: input, shape index: {}]   ;;  %s1080_s2 = inlined_call_operand.hbm [shape: f32[1,256], index: 2, kind: input, shape index: {}]   ;;  %s1081_s3 = inlined_call_operand.hbm [shape: f32[256,128], index: 3, kind: input, shape index: {}]   ;;  %s1082_s4 = inlined_call_operand.hbm [shape: f32[1,128], index: 4, kind: input, shape index: {}]   ;;  %s1083_s5 = inlined_call_operand.hbm [shape: f32[1,128], index: 5, kind: input, shape index: {}]   ;;  %s1084_s6 = inlined_call_operand.hbm [shape: f32[1,128], index: 6, kind: input, shape index: {}]   ;;  %s1085_s7 = inlined_call_operand.hbm [shape: f32[128,128], index: 7, kind: input, shape index: {}]   ;;  %s1086_s8 = inlined_call_operand.hbm [shape: f32[1,128], index: 8, kind: input, shape index: {}]   ;;  %s1087_s9 = inlined_call_operand.hbm [shape: f32[8,128], index: 9, kind: output, shape index: {}]  }
   0x1   :  { %15 = vsyncpa [#allocation6], 0 }
   0x2   :  { %16 = vsyncpa [#allocation9], 0 }
   0x3   :  { %17 = vsyncpa [#allocation12], 0 }
   0x4   :  { %18 = vsyncpa [#allocation15], 0 }
   0x5   :  { %19 = vsyncpa [#allocation4], 0  ;;  %s858_s30 = smov [#allocation5]   ;;  %s859_s11 = smov [#allocation8]  }
   0x6   :  { %s36_s10 = sshll.u32 %s858_s30, 4  ;;  %s55_s12 = sshll.u32 %s859_s11, 4  ;;  %s37_s10 = int_to_ptr.vmem [resolvable:$true] %s36_s10  ;;  %s923_s12 = int_to_ptr.vmem [resolvable:$true] %s55_s12 }
   0x7   :  { %s626_s15 = scalar_lea.hbm %s1079_s1, 32 }
   0x8   :  { %p627_p0 = scmp.ne.s32.totalorder %s1079_s1, %s626_s15  ;;  %p630_p1 = scmp.lt.u32.totalorder %s626_s15, %s1079_s1 }
   0xa   :  { %p632_p2 = pnand %p630_p1, %p627_p0 }
   0xc   :  { %635 = shalt.err (!%p632_p2)
}
   0xd   :  { %s636_s20 = scalar_lea.vmem %s37_s10, 32  ;;  %p641_p4 = scmp.lt.s32.totalorder %s37_s10, %s37_s10 }
   0xe   :  { %p637_p3 = scmp.ne.s32.totalorder %s37_s10, %s636_s20  ;;  %p642_p5 = scmp.lt.s32.totalorder %s636_s20, %s636_s20 }
  0x10   :  { %p643_p6 = por %p642_p5, %p641_p4 }
  0x12   :  { %p644_p7 = pnand %p643_p6, %p637_p3 }
  0x14   :  { %647 = shalt.err (!%p644_p7)
}
  0x15   :  { %39 = dma.hbm_to_vmem [thread:$0]  %s1079_s1, 32, %s37_s10, [#allocation6]  }
  0x16   :  { %s648_s25 = scalar_lea.hbm %s1081_s3, 4096 }
  0x17   :  { %p649_p8 = scmp.ne.s32.totalorder %s1081_s3, %s648_s25  ;;  %p652_p9 = scmp.lt.u32.totalorder %s648_s25, %s1081_s3 }
  0x19   :  { %p654_p10 = pnand %p652_p9, %p649_p8 }
  0x1b   :  { %657 = shalt.err (!%p654_p10)
}
  0x1c   :  { %s658_s30 = scalar_lea.vmem %s923_s12, 4096  ;;  %p663_p12 = scmp.lt.s32.totalorder %s923_s12, %s923_s12 }
  0x1d   :  { %p659_p11 = scmp.ne.s32.totalorder %s923_s12, %s658_s30  ;;  %p664_p13 = scmp.lt.s32.totalorder %s658_s30, %s658_s30 }
  0x1f   :  { %p665_p0 = por %p664_p13, %p663_p12 }
  0x21   :  { %p666_p1 = pnand %p665_p0, %p659_p11 }
  0x23   :  { %669 = shalt.err (!%p666_p1)
}
  0x24   :  { %s860_s1 = smov 128   ;;  %s861_s10 = smov 8  }
  0x25   :  { %61 = dma.hbm_to_vmem [thread:$0]  %s1081_s3, 4096, %s923_s12, [#allocation9], %s860_s1, %s860_s1, %s861_s10  }
  0x26   :  { %s862_s14 = smov [#allocation11]   ;;  %s863_s16 = smov [#allocation14]  }
  0x27   :  { %s78_s15 = sshll.u32 %s862_s14, 4  ;;  %s97_s17 = sshll.u32 %s863_s16, 4  ;;  %s79_s15 = int_to_ptr.vmem [resolvable:$true] %s78_s15  ;;  %s957_s17 = int_to_ptr.vmem [resolvable:$true] %s97_s17 }
  0x28   :  { %s670_s20 = scalar_lea.hbm %s1083_s5, 16 }
  0x29   :  { %p671_p2 = scmp.ne.s32.totalorder %s1083_s5, %s670_s20  ;;  %p674_p3 = scmp.lt.u32.totalorder %s670_s20, %s1083_s5 }
  0x2b   :  { %p676_p4 = pnand %p674_p3, %p671_p2 }
  0x2d   :  { %679 = shalt.err (!%p676_p4)
}
  0x2e   :  { %s680_s3 = scalar_lea.vmem %s79_s15, 16  ;;  %s684_s12 = scalar_lea.vmem %s79_s15, 32 }
  0x2f   :  { %p681_p5 = scmp.ne.s32.totalorder %s79_s15, %s680_s3  ;;  %p685_p6 = scmp.lt.s32.totalorder %s79_s15, %s79_s15 }
  0x30   :  { %p686_p7 = scmp.lt.s32.totalorder %s684_s12, %s680_s3 }
  0x32   :  { %p687_p8 = por %p686_p7, %p685_p6 }
  0x34   :  { %p688_p9 = pnand %p687_p8, %p681_p5 }
  0x36   :  { %691 = shalt.err (!%p688_p9)
}
  0x37   :  { %81 = dma.hbm_to_vmem [thread:$0]  %s1083_s5, 16, %s79_s15, [#allocation12]  }
  0x38   :  { %s692_s29 = scalar_lea.hbm %s1085_s7, 2048 }
  0x39   :  { %p693_p10 = scmp.ne.s32.totalorder %s1085_s7, %s692_s29  ;;  %p696_p11 = scmp.lt.u32.totalorder %s692_s29, %s1085_s7 }
  0x3b   :  { %p698_p12 = pnand %p696_p11, %p693_p10 }
  0x3d   :  { %701 = shalt.err (!%p698_p12)
}
  0x3e   :  { %s702_s16 = scalar_lea.vmem %s957_s17, 2048  ;;  %p707_p0 = scmp.lt.s32.totalorder %s957_s17, %s957_s17 }
  0x3f   :  { %p703_p13 = scmp.ne.s32.totalorder %s957_s17, %s702_s16  ;;  %p708_p1 = scmp.lt.s32.totalorder %s702_s16, %s702_s16 }
  0x41   :  { %p709_p2 = por %p708_p1, %p707_p0 }
  0x43   :  { %p710_p3 = pnand %p709_p2, %p703_p13 }
  0x45   :  { %713 = shalt.err (!%p710_p3)
}
  0x46   :  { %103 = dma.hbm_to_vmem [thread:$0]  %s1085_s7, 2048, %s957_s17, [#allocation15], %s860_s1, %s860_s1, %s861_s10  }
  0x47   :  { %s864_s18 = smov [#allocation2]   ;;  %s865_s20 = smov [#allocation7]  }
  0x48   :  { %s26_s19 = sshll.u32 %s864_s18, 4  ;;  %s46_s21 = sshll.u32 %s865_s20, 4  ;;  %s27_s19 = int_to_ptr.vmem [resolvable:$true] %s26_s19  ;;  %s47_s21 = int_to_ptr.vmem [resolvable:$true] %s46_s21 }
  0x49   :  { %s714_s24 = scalar_lea.hbm %s1078_s0, 256 }
  0x4a   :  { %p715_p4 = scmp.ne.s32.totalorder %s1078_s0, %s714_s24  ;;  %p718_p5 = scmp.lt.u32.totalorder %s714_s24, %s1078_s0 }
  0x4c   :  { %p720_p6 = pnand %p718_p5, %p715_p4 }
  0x4e   :  { %723 = shalt.err (!%p720_p6)
}
  0x4f   :  { %s724_s7 = scalar_lea.vmem %s27_s19, 256  ;;  %p729_p8 = scmp.lt.s32.totalorder %s27_s19, %s27_s19 }
  0x50   :  { %p725_p7 = scmp.ne.s32.totalorder %s27_s19, %s724_s7  ;;  %p730_p9 = scmp.lt.s32.totalorder %s724_s7, %s724_s7 }
  0x52   :  { %p731_p10 = por %p730_p9, %p729_p8 }
  0x54   :  { %p732_p11 = pnand %p731_p10, %p725_p7 }
  0x56   :  { %735 = shalt.err (!%p732_p11)
}
  0x57   :  { %29 = dma.hbm_to_vmem [thread:$0]  %s1078_s0, 256, %s27_s19, [#allocation3]  }
  0x58   :  { %s736_s28 = scalar_lea.hbm %s1080_s2, 32 }
  0x59   :  { %p737_p12 = scmp.ne.s32.totalorder %s1080_s2, %s736_s28  ;;  %p740_p13 = scmp.lt.u32.totalorder %s736_s28, %s1080_s2 }
  0x5b   :  { %p742_p0 = pnand %p740_p13, %p737_p12 }
  0x5d   :  { %745 = shalt.err (!%p742_p0)
}
  0x5e   :  { %s746_s14 = scalar_lea.vmem %s47_s21, 32  ;;  %p751_p2 = scmp.lt.s32.totalorder %s47_s21, %s47_s21 }
  0x5f   :  { %p747_p1 = scmp.ne.s32.totalorder %s47_s21, %s746_s14  ;;  %p752_p3 = scmp.lt.s32.totalorder %s746_s14, %s746_s14 }
  0x61   :  { %p753_p4 = por %p752_p3, %p751_p2 }
  0x63   :  { %p754_p5 = pnand %p753_p4, %p747_p1 }
  0x65   :  { %757 = shalt.err (!%p754_p5)
}
  0x66   :  { %49 = dma.hbm_to_vmem [thread:$0]  %s1080_s2, 32, %s47_s21, [#allocation6]  }
  0x67   :  { %s866_s5 = smov [#allocation10]   ;;  %s867_s18 = smov [#allocation13]  }
  0x68   :  { %s68_s15 = sshll.u32 %s866_s5, 4  ;;  %s88_s19 = sshll.u32 %s867_s18, 4  ;;  %s69_s15 = int_to_ptr.vmem [resolvable:$true] %s68_s15  ;;  %s89_s19 = int_to_ptr.vmem [resolvable:$true] %s88_s19 }
  0x69   :  { %s758_s23 = scalar_lea.hbm %s1082_s4, 16 }
  0x6a   :  { %p759_p6 = scmp.ne.s32.totalorder %s1082_s4, %s758_s23  ;;  %p762_p7 = scmp.lt.u32.totalorder %s758_s23, %s1082_s4 }
  0x6c   :  { %p764_p8 = pnand %p762_p7, %p759_p6 }
  0x6e   :  { %767 = shalt.err (!%p764_p8)
}
  0x6f   :  { %s768_s2 = scalar_lea.vmem %s69_s15, 16  ;;  %s772_s21 = scalar_lea.vmem %s69_s15, 32 }
  0x70   :  { %p769_p9 = scmp.ne.s32.totalorder %s69_s15, %s768_s2  ;;  %p773_p10 = scmp.lt.s32.totalorder %s69_s15, %s69_s15 }
  0x71   :  { %p774_p11 = scmp.lt.s32.totalorder %s772_s21, %s768_s2 }
  0x73   :  { %p775_p12 = por %p774_p11, %p773_p10 }
  0x75   :  { %p776_p13 = pnand %p775_p12, %p769_p9 }
  0x77   :  { %779 = shalt.err (!%p776_p13)
}
  0x78   :  { %71 = dma.hbm_to_vmem [thread:$0]  %s1082_s4, 16, %s69_s15, [#allocation9]  }
  0x79   :  { %s780_s17 = scalar_lea.hbm %s1084_s6, 16 }
  0x7a   :  { %p781_p0 = scmp.ne.s32.totalorder %s1084_s6, %s780_s17  ;;  %p784_p1 = scmp.lt.u32.totalorder %s780_s17, %s1084_s6 }
  0x7c   :  { %p786_p2 = pnand %p784_p1, %p781_p0 }
  0x7e   :  { %789 = shalt.err (!%p786_p2)
}
  0x7f   :  { %s790_s11 = scalar_lea.vmem %s89_s19, 16  ;;  %s794_s13 = scalar_lea.vmem %s89_s19, 32 }
  0x80   :  { %p791_p3 = scmp.ne.s32.totalorder %s89_s19, %s790_s11  ;;  %p795_p4 = scmp.lt.s32.totalorder %s89_s19, %s89_s19 }
  0x81   :  { %p796_p5 = scmp.lt.s32.totalorder %s794_s13, %s790_s11 }
  0x83   :  { %p797_p6 = por %p796_p5, %p795_p4 }
  0x85   :  { %p798_p7 = pnand %p797_p6, %p791_p3 }
  0x87   :  { %801 = shalt.err (!%p798_p7)
}
  0x88   :  { %91 = dma.hbm_to_vmem [thread:$0]  %s1084_s6, 16, %s89_s19, [#allocation12]  }
  0x89   :  { %s868_s0 = smov [#allocation16]   ;;  %s802_s18 = scalar_lea.hbm %s1086_s8, 16 }
  0x8a   :  { %s110_s16 = sshll.u32 %s868_s0, 4  ;;  %p803_p8 = scmp.ne.s32.totalorder %s1086_s8, %s802_s18  ;;  %s111_s16 = int_to_ptr.vmem [resolvable:$true] %s110_s16 }
  0x8b   :  { %p806_p9 = scmp.lt.u32.totalorder %s802_s18, %s1086_s8 }
  0x8d   :  { %p808_p10 = pnand %p806_p9, %p803_p8 }
  0x8f   :  { %811 = shalt.err (!%p808_p10)
}
  0x90   :  { %s812_s3 = scalar_lea.vmem %s111_s16, 16  ;;  %s816_s6 = scalar_lea.vmem %s111_s16, 32 }
  0x91   :  { %p813_p11 = scmp.ne.s32.totalorder %s111_s16, %s812_s3  ;;  %p817_p12 = scmp.lt.s32.totalorder %s111_s16, %s111_s16 }
  0x92   :  { %p818_p13 = scmp.lt.s32.totalorder %s816_s6, %s812_s3 }
  0x94   :  { %p819_p0 = por %p818_p13, %p817_p12 }
  0x96   :  { %p820_p1 = pnand %p819_p0, %p813_p11 }
  0x98   :  { %823 = shalt.err (!%p820_p1)
}
  0x99   :  { %113 = dma.hbm_to_vmem [thread:$0]  %s1086_s8, 16, %s111_s16, [#allocation15]  }
  0x9a   :  { %846 = dma.done.wait [#allocation3], 256  }
  0x9b   :  { %847 = vsyncadd [#allocation3], 4294967040 }
  0x9c   :  { %848 = dma.done.wait [#allocation6], 64  }
  0x9d   :  { %849 = vsyncadd [#allocation6], 4294967232 }
  0x9e   :  { %850 = dma.done.wait [#allocation9], 4112  }
  0x9f   :  { %851 = vsyncadd [#allocation9], 4294963184 }
  0xa0   :  { %852 = dma.done.wait [#allocation12], 32  }
  0xa1   :  { %853 = vsyncadd [#allocation12], 4294967264 }
  0xa2   :  { %854 = dma.done.wait [#allocation15], 2064  }
  0xa3   :  { %855 = vsyncadd [#allocation15], 4294965232  ;;  %v141_v0 = vld [vmem:[#allocation2] sm:$0xff]  ;;  %v142_v1 = vld [vmem:[#allocation2 + $0x8] sm:$0xff]  ;;  %v168_v63 = vlaneseq  ;;  %vm870_vm2 = vmmov 0   ;;  %s872_s8 = smov [#allocation17]  }
  0xa4   :  { %v145_v2 = vadd.f32 %v142_v1, %v141_v0  ;;  %v211_v10 = vld [vmem:[#allocation8 + $0x80] sm:$0xff]  ;;  %v212_v11 = vld [vmem:[#allocation8 + $0x88] sm:$0xff]  ;;  %v213_v16 = vld [vmem:[#allocation8 + $0x90] sm:$0xff]  ;;  %s441_s25 = sshll.u32 %s872_s8, 4  ;;  %s442_s25 = int_to_ptr.vmem [resolvable:$true] %s441_s25 }
  0xa5   :  { %v545_v12 = vpack.c.bf16 %v212_v11, %v211_v10  ;;  %v195_v13 = vld [vmem:[#allocation8] sm:$0xff]  ;;  %v196_v14 = vld [vmem:[#allocation8 + $0x8] sm:$0xff]  ;;  %v214_v17 = vld [vmem:[#allocation8 + $0x98] sm:$0xff]  ;;  %s824_s2 = scalar_lea.vmem %s442_s25, 128  ;;  %p829_p3 = scmp.lt.s32.totalorder %s442_s25, %s442_s25 }
  0xa6   :  { %146 = vadd.xlane.f32.xlu0 %v145_v2  ;;  %v547_v15 = vpack.c.bf16 %v196_v14, %v195_v13  ;;  %v549_v18 = vpack.c.bf16 %v214_v17, %v213_v16  ;;  %v197_v19 = vld [vmem:[#allocation8 + $0x10] sm:$0xff]  ;;  %v198_v20 = vld [vmem:[#allocation8 + $0x18] sm:$0xff]  ;;  %v215_v22 = vld [vmem:[#allocation8 + $0xa0] sm:$0xff]  ;;  %p825_p2 = scmp.ne.s32.totalorder %s442_s25, %s824_s2  ;;  %p830_p4 = scmp.lt.s32.totalorder %s824_s2, %s824_s2 }
  0xa7   :  { %546 = vmatprep.subr.bf16.mxu0 %v545_v12  ;;  %v551_v21 = vpack.c.bf16 %v198_v20, %v197_v19  ;;  %v216_v23 = vld [vmem:[#allocation8 + $0xa8] sm:$0xff]  ;;  %v199_v25 = vld [vmem:[#allocation8 + $0x20] sm:$0xff]  ;;  %v217_v28 = vld [vmem:[#allocation8 + $0xb0] sm:$0xff] }
  0xa8   :  { %548 = vmatpush3.bf16.msra.mxu0 %v547_v15  ;;  %v553_v24 = vpack.c.bf16 %v216_v23, %v215_v22  ;;  %v200_v26 = vld [vmem:[#allocation8 + $0x28] sm:$0xff]  ;;  %v218_v29 = vld [vmem:[#allocation8 + $0xb8] sm:$0xff]  ;;  %v201_v31 = vld [vmem:[#allocation8 + $0x30] sm:$0xff]  ;;  %p831_p5 = por %p830_p4, %p829_p3 }
  0xa9   :  { %550 = vmatprep.subr.bf16.mxu0 %v549_v18  ;;  %v555_v27 = vpack.c.bf16 %v200_v26, %v199_v25  ;;  %v557_v30 = vpack.c.bf16 %v218_v29, %v217_v28  ;;  %v202_v32 = vld [vmem:[#allocation8 + $0x38] sm:$0xff]  ;;  %v219_v33 = vld [vmem:[#allocation8 + $0xc0] sm:$0xff]  ;;  %v220_v35 = vld [vmem:[#allocation8 + $0xc8] sm:$0xff] }
  0xaa   :  { %v559_v34 = vpack.c.bf16 %v202_v32, %v201_v31  ;;  %v203_v36 = vld [vmem:[#allocation8 + $0x40] sm:$0xff]  ;;  %v204_v37 = vld [vmem:[#allocation8 + $0x48] sm:$0xff]  ;;  %v561_v38 = vpack.c.bf16 %v220_v35, %v219_v33  ;;  %v221_v39 = vld [vmem:[#allocation8 + $0xd0] sm:$0xff]  ;;  %v869_v31 = vmov 0.0|0.0   ;;  %p832_p6 = pnand %p831_p5, %p825_p2 }
  0xab   :  { %v222_v40 = vld [vmem:[#allocation8 + $0xd8] sm:$0xff]  ;;  %v563_v41 = vpack.c.bf16 %v204_v37, %v203_v36  ;;  %v205_v43 = vld [vmem:[#allocation8 + $0x50] sm:$0xff]  ;;  %v223_v45 = vld [vmem:[#allocation8 + $0xe0] sm:$0xff]  ;;  %577 = vmatprep.subr.bf16.mxu1 %v869_v31 }
  0xac   :  { %552 = vmatpush3.bf16.msra.mxu0 %v551_v21  ;;  %v565_v42 = vpack.c.bf16 %v222_v40, %v221_v39  ;;  %v206_v44 = vld [vmem:[#allocation8 + $0x58] sm:$0xff]  ;;  %v224_v46 = vld [vmem:[#allocation8 + $0xe8] sm:$0xff]  ;;  %v207_v49 = vld [vmem:[#allocation8 + $0x60] sm:$0xff] }
  0xad   :  { %554 = vmatprep.subr.bf16.mxu0 %v553_v24  ;;  %v567_v47 = vpack.c.bf16 %v206_v44, %v205_v43  ;;  %v569_v48 = vpack.c.bf16 %v224_v46, %v223_v45  ;;  %v208_v50 = vld [vmem:[#allocation8 + $0x68] sm:$0xff]  ;;  %v225_v51 = vld [vmem:[#allocation8 + $0xf0] sm:$0xff]  ;;  %v226_v52 = vld [vmem:[#allocation8 + $0xf8] sm:$0xff]  ;;  %v871_v43 = vmov 0.0  }
  0xae   :  { %v571_v53 = vpack.c.bf16 %v208_v50, %v207_v49  ;;  %v573_v54 = vpack.c.bf16 %v226_v52, %v225_v51  ;;  %v209_v55 = vld [vmem:[#allocation8 + $0x70] sm:$0xff]  ;;  %v210_v56 = vld [vmem:[#allocation8 + $0x78] sm:$0xff]  ;;  %v454_v23 = vld [vmem:[#allocation10] ss:$0 sm:$0xff]  ;;  %542 = vmatprep.mubr.msk.f32.mxu1 %vm870_vm2, %v871_v43 }
  0xaf   :  { %v575_v57 = vpack.c.bf16 %v210_v56, %v209_v55  ;;  %v144_v11 = vld [vmem:[#allocation7] sm:$0x3]  ;;  %v342_v32 = vld [vmem:[#allocation14 + $0x10] sm:$0xff]  ;;  %v344_v35 = vld [vmem:[#allocation14 + $0x20] sm:$0xff] }
  0xb0   :  { %556 = vmatpush3.bf16.msra.mxu0 %v555_v27  ;;  %v343_v33 = vld [vmem:[#allocation14 + $0x18] sm:$0xff]  ;;  %v345_v36 = vld [vmem:[#allocation14 + $0x28] sm:$0xff]  ;;  %v348_v40 = vld [vmem:[#allocation14 + $0x40] sm:$0xff] }
  0xb1   :  { %558 = vmatprep.subr.bf16.mxu0 %v557_v30  ;;  %v584_v37 = vpack.c.bf16 %v345_v36, %v344_v35  ;;  %v347_v39 = vld [vmem:[#allocation14 + $0x38] sm:$0xff]  ;;  %v350_v45 = vld [vmem:[#allocation14 + $0x50] sm:$0xff]  ;;  %v353_v49 = vld [vmem:[#allocation14 + $0x68] sm:$0xff] }
  0xb2   :  { %v351_v46 = vld [vmem:[#allocation14 + $0x58] sm:$0xff]  ;;  %v354_v51 = vld [vmem:[#allocation14 + $0x70] sm:$0xff] }
  0xb3   :  { %v355_v52 = vld [vmem:[#allocation14 + $0x78] sm:$0xff] }
  0xb4   :  { %560 = vmatpush3.bf16.msra.mxu0 %v559_v34  ;;  %v581_v34 = vpack.c.bf16 %v343_v33, %v342_v32 }
  0xb5   :  { %562 = vmatprep.subr.bf16.mxu0 %v561_v38  ;;  %v346_v38 = vld [vmem:[#allocation14 + $0x30] sm:$0xff] }
  0xb8   :  { %564 = vmatpush3.bf16.msra.mxu0 %v563_v41  ;;  %v587_v41 = vpack.c.bf16 %v347_v39, %v346_v38 }
  0xb9   :  { %566 = vmatprep.subr.bf16.mxu0 %v565_v42  ;;  %v349_v42 = vld [vmem:[#allocation14 + $0x48] sm:$0xff] }
  0xba   :  { %v590_v44 = vpack.c.bf16 %v349_v42, %v348_v40 }
  0xbc   :  { %568 = vmatpush3.bf16.msra.mxu0 %v567_v47  ;;  %v593_v47 = vpack.c.bf16 %v351_v46, %v350_v45 }
  0xbd   :  { %570 = vmatprep.subr.bf16.mxu0 %v569_v48  ;;  %v352_v48 = vld [vmem:[#allocation14 + $0x60] sm:$0xff] }
  0xbe   :  { %v596_v50 = vpack.c.bf16 %v353_v49, %v352_v48 }
  0xc0   :  { %572 = vmatpush3.bf16.msra.mxu0 %v571_v53  ;;  %v599_v53 = vpack.c.bf16 %v355_v52, %v354_v51 }
  0xc1   :  { %574 = vmatprep.subr.bf16.mxu0 %v573_v54 }
  0xc4   :  { %576 = vmatpush3.bf16.msra.mxu0 %v575_v57 }
 0x133   :  { %v147_v3 = vpop.xlane.xlu0 %146 }
 0x134   :  { %v149_v4 = vmul.f32 0.00390625, %v147_v3  ;;  %v169_v3 = vshrl.u32 %v168_v63, 7 }
 0x136   :  { %v1051_v5 = vsub.f32 %v141_v0, %v149_v4  ;;  %v1053_v6 = vsub.f32 %v142_v1, %v149_v4  ;;  %v170_v4 = vsub.s32 0, %v169_v3 }
 0x138   :  { %v152_v7 = vmul.f32 %v1051_v5, %v1051_v5  ;;  %v153_v8 = vmul.f32 %v1053_v6, %v1053_v6  ;;  %v186_v14 = vrot.slane %v144_v11, %v170_v4 }
 0x13a   :  { %v154_v9 = vadd.f32 %v153_v8, %v152_v7  ;;  %v174_v7 = vsub.s32 1, %v169_v3  ;;  %v143_v8 = vld [vmem:[#allocation5] sm:$0x3] }
 0x13c   :  { %155 = vadd.xlane.f32.xlu0 %v154_v9  ;;  %v171_v9 = vrot.slane %v143_v8, %v170_v4  ;;  %v175_v10 = vrot.slane %v143_v8, %v174_v7  ;;  %v190_v15 = vrot.slane %v144_v11, %v174_v7  ;;  %v457_v7 = vld [vmem:[#allocation16] ss:$0 sm:$0xff] }
 0x1c9   :  { %v156_v58 = vpop.xlane.xlu0 %155 }
 0x1ca   :  { %v157_v59 = vmul.f32 0.003921569, %v156_v58 }
 0x1cc   :  { %616 = vrsqrt.f32 %v157_v59  ;;  %vm160_vm0 = vcmp.eq.f32.partialorder %v157_v59, inf  ;;  %v163_v62 = vand.u32 2147483648, %v157_v59  ;;  %vm162_vm1 = vcmp.eq.f32.partialorder %v157_v59, 0.0 }
 0x1d6   :  { %v617_v60 = vpop.eup %616 }
 0x1d7   :  { %v159_v61 = vmul.f32 %v617_v60, %v157_v59 }
 0x1d9   :  { %v161_v0 = vsel %vm160_vm0, %v157_v59, %v159_v61 }
 0x1da   :  { %v164_v1 = vsel %vm162_vm1, %v163_v62, %v161_v0  ;;  %v455_v62 = vld [vmem:[#allocation11] ss:$0 sm:$0xff] }
 0x1db   :  { %v165_v2 = vadd.f32 1e-06, %v164_v1  ;;  %v456_v1 = vld [vmem:[#allocation13] ss:$0 sm:$0xff] }
 0x1dd   :  { %618 = vrcp.f32 %v165_v2 }
 0x1e7   :  { %v619_v12 = vpop.eup %618 }
 0x1e8   :  { %v179_v13 = vmul.f32 %v619_v12, %v175_v10  ;;  %v178_v16 = vmul.f32 %v619_v12, %v171_v9 }
 0x1ea   :  { %v181_v17 = vmul.f32 %v179_v13, %v1053_v6  ;;  %v180_v18 = vmul.f32 %v178_v16, %v1051_v5  ;;  %v340_v6 = vld [vmem:[#allocation14] sm:$0xff]  ;;  %v341_v5 = vld [vmem:[#allocation14 + $0x8] sm:$0xff] }
 0x1eb   :  { %v578_v30 = vpack.c.bf16 %v341_v5, %v340_v6 }
 0x1ec   :  { %v194_v19 = vadd.f32 %v190_v15, %v181_v17  ;;  %v193_v20 = vadd.f32 %v186_v14, %v180_v18 }
 0x1ed   :  { %579 = vmatpush3.bf16.msra.mxu1 %v578_v30 }
 0x1ee   :  { %298 = vmatprep.mubr.f32.mxu0 %v194_v19  ;;  %580 = vmatprep.subr.bf16.mxu1 %v869_v31 }
 0x1ef   :  { %299 = vmatmul.mubr.f32.vlgmr.msra.gmra.mrb[0].mxu0 %v193_v20 }
 0x1f1   :  { %582 = vmatpush3.bf16.msra.mxu1 %v581_v34 }
 0x1f2   :  { %583 = vmatprep.subr.bf16.mxu1 %v869_v31 }
 0x1f5   :  { %585 = vmatpush3.bf16.msra.mxu1 %v584_v37 }
 0x1f6   :  { %586 = vmatprep.subr.bf16.mxu1 %v869_v31 }
 0x1f9   :  { %588 = vmatpush3.bf16.msra.mxu1 %v587_v41 }
 0x1fa   :  { %589 = vmatprep.subr.bf16.mxu1 %v869_v31 }
 0x1fd   :  { %591 = vmatpush3.bf16.msra.mxu1 %v590_v44 }
 0x1fe   :  { %592 = vmatprep.subr.bf16.mxu1 %v869_v31 }
 0x201   :  { %594 = vmatpush3.bf16.msra.mxu1 %v593_v47 }
 0x202   :  { %595 = vmatprep.subr.bf16.mxu1 %v869_v31 }
 0x205   :  { %597 = vmatpush3.bf16.msra.mxu1 %v596_v50 }
 0x206   :  { %598 = vmatprep.subr.bf16.mxu1 %v869_v31 }
 0x209   :  { %600 = vmatpush3.bf16.msra.mxu1 %v599_v53 }
 0x2c2   :  { %v490_v21 = vpop.f32.mrb[0].mxu0 }
 0x2c3   :  { %v491_v22 = vpop.f32.mrb[1].mxu0 }
 0x2c4   :  { %v492_v24 = vadd.f32 %v491_v22, %v490_v21 }
 0x2c6   :  { %v301_v25 = vadd.f32 %v492_v24, %v454_v23 }
 0x2c8   :  { %306 = vadd.xlane.f32.xlu1 %v301_v25 }
 0x355   :  { %v307_v26 = vpop.xlane.xlu1 %306 }
 0x356   :  { %v309_v27 = vmul.f32 0.0078125, %v307_v26 }
 0x358   :  { %v1061_v28 = vsub.f32 %v301_v25, %v309_v27 }
 0x35a   :  { %v311_v29 = vmul.f32 %v1061_v28, %v1061_v28 }
 0x35c   :  { %312 = vadd.xlane.f32.xlu1 %v311_v29 }
 0x3e9   :  { %v313_v54 = vpop.xlane.xlu1 %312 }
 0x3ea   :  { %v314_v55 = vmul.f32 0.007874016, %v313_v54 }
 0x3ec   :  { %620 = vrsqrt.f32 %v314_v55  ;;  %vm317_vm3 = vcmp.eq.f32.partialorder %v314_v55, inf  ;;  %v320_v58 = vand.u32 2147483648, %v314_v55  ;;  %vm319_vm4 = vcmp.eq.f32.partialorder %v314_v55, 0.0 }
 0x3f6   :  { %v621_v56 = vpop.eup %620 }
 0x3f7   :  { %v316_v57 = vmul.f32 %v621_v56, %v314_v55 }
 0x3f9   :  { %v318_v59 = vsel %vm317_vm3, %v314_v55, %v316_v57 }
 0x3fa   :  { %v321_v60 = vsel %vm319_vm4, %v320_v58, %v318_v59 }
 0x3fb   :  { %v322_v61 = vadd.f32 1e-06, %v321_v60 }
 0x3fd   :  { %622 = vrcp.f32 %v322_v61 }
 0x407   :  { %v623_v63 = vpop.eup %622 }
 0x408   :  { %v330_v0 = vmul.f32 %v623_v63, %v455_v62 }
 0x40a   :  { %v331_v2 = vmul.f32 %v330_v0, %v1061_v28 }
 0x40c   :  { %v338_v3 = vadd.f32 %v456_v1, %v331_v2 }
 0x40e   :  { %v339_v4 = vmax.f32 %v338_v3, 0.0 }
 0x410   :  { %543 = vmatmul.mubr.f32.vlgmr.msra.gmra.mrb[0].mxu1 %v339_v4 }
 0x4e3   :  { %v429_v8 = vpop.f32.mrb[0].mxu1 }
 0x4e4   :  { %v430_v9 = vadd.f32 %v457_v7, %v429_v8  ;;  %v544_v10 = vpop.f32.mrb[1].mxu1 }
 0x4e6   :  { %624 = vtanh.f32 %v430_v9 }
 0x4f0   :  { %v625_v11 = vpop.eup %624 }
 0x4f1   :  { %434 = vst [vmem:[#allocation17] sm:$0xff] %v625_v11 }
 0x4f2   :  { %835 = shalt.err (!%p832_p6)
}
 0x4f3   :  { %s836_s7 = scalar_lea.hbm %s1087_s9, 128 }
 0x4f4   :  { %p837_p7 = scmp.ne.s32.totalorder %s1087_s9, %s836_s7  ;;  %p840_p8 = scmp.lt.u32.totalorder %s836_s7, %s1087_s9 }
 0x4f6   :  { %p842_p9 = pnand %p840_p8, %p837_p7 }
 0x4f8   :  { %845 = shalt.err (!%p842_p9)
}
 0x4f9   :  { %444 = dma.vmem_to_hbm [thread:$0]  %s442_s25, 128, %s1087_s9, [#allocation4]  }
 0x4fa   :  { %856 = dma.done.wait [#allocation4], 128  }
 0x4fb   :  { %857 = vsyncadd [#allocation4], 4294967168 }
 0x4fc   :  { %448 = vsyncpa [#allocation3], 1 }
 0x4fd   :  { %449 = vsyncpa [#allocation6], 1 }
 0x4fe   :  { %450 = vsyncpa [#allocation9], 1 }
 0x4ff   :  { %451 = vsyncpa [#allocation12], 1 }
 0x500   :  { %452 = vsyncpa [#allocation15], 1 }
 0x501   :  { %453 = vsyncpa [#allocation4], 1 }

</bundles_post_ra>
